<compile_context>
chip_gen: v6e
topology: v6e:2x2x1
jax: 0.10.0
libtpu: 0.0.40
codegen_flags: <defaults>
</compile_context>

<pallas_src>
import jax
import jax.numpy as jnp
from jax.experimental import pallas as pl
from jax.experimental.pallas import tpu as pltpu

ALPHA = 1.0        # static; multiply skipped when == 1.0
GAMMA = 2.0        # static; kernel uses an explicit square
LANES = 128
BLOCK_ROWS = 1024  # (1024,128) f32 tile = 512 KiB; 2 inputs x 2 bufs = 2 MiB


def _make_focal_kernel(num_tiles: int, block_rows: int, rem_last: int,
                       hard_targets: bool):
    """Build the kernel with all tile geometry baked in as Python constants."""
    full_tile = block_rows * LANES
    has_tail = rem_last != full_tile  # last tile needs masking?

    def kernel(pred_ref, tgt_ref, out_ref):
        # Compute in f32 regardless of input dtype (v5e has no bf16 VPU/EUP).
        x = pred_ref[...].astype(jnp.float32)
        t = tgt_ref[...].astype(jnp.float32)

        # Numerically stable binary_cross_entropy_with_logits (reduction='none'):
        #   bce = max(x, 0) - x*t + log1p(exp(-|x|))
        e = jnp.exp(-jnp.abs(x))
        bce = jnp.maximum(x, 0.0) - x * t + jnp.log1p(e)

        if hard_targets:
            # p_t = exp(-bce) == t*sigmoid(x) + (1-t)*(1-sigmoid(x)) for t in {0,1}.
            # Reuse e: sigmoid(|x|) = 1/(1+e); flip via select on sign(x).
            # TODO(synk): soft labels need the exp(-bce) path (hard_targets=False).
            r = pl.reciprocal(1.0 + e, approx=True)   # sigmoid(|x|)
            s = jnp.where(x >= 0.0, r, 1.0 - r)       # sigmoid(x)
            one_m = t + s - 2.0 * t * s               # == 1 - p_t
        else:
            one_m = 1.0 - jnp.exp(-bce)               # exact for soft labels

        focal = (one_m * one_m) * bce                 # gamma == 2 -> square
        if ALPHA != 1.0:
            focal = ALPHA * focal

        rows, cols = focal.shape  # static block shape; rows % 8 == 0

        def partial_sum(v):
            # (rows, 128) -> (8, 128): adds across vregs (VALU only); the
            # expensive cross-lane reduction happens once in the wrapper.
            return jnp.sum(v.reshape(rows // 8, 8, cols), axis=0)

        def masked_partial():
            # Valid element count in this tile is the static `rem_last`.
            q, rmod = divmod(rem_last, LANES)
            row_id = jax.lax.broadcasted_iota(jnp.int32, (rows, cols), 0)
            if rmod == 0:
                mask = row_id < q
            else:
                lane_id = jax.lax.broadcasted_iota(jnp.int32, (rows, cols), 1)
                mask = (row_id < q) | ((row_id == q) & (lane_id < rmod))
            # Select (NOT multiply): Pallas-padded rows of a partial last block
            # hold unspecified bits; a multiply-by-zero could propagate NaN.
            return partial_sum(jnp.where(mask, focal, 0.0))

        if not has_tail:
            # Every tile is fully valid: single unmasked fast path, no branch.
            out_ref[...] = partial_sum(focal)
        elif num_tiles == 1:
            out_ref[...] = masked_partial()
        else:
            i = pl.program_id(0)
            last = num_tiles - 1

            @pl.when(i != last)
            def _():
                out_ref[...] = partial_sum(focal)

            @pl.when(i == last)
            def _():
                out_ref[...] = masked_partial()

    return kernel


def focal_loss(predictions: jax.Array, targets: jax.Array,
               hard_targets: bool = True) -> jax.Array:
    """Pallas implementation of FocalLoss(alpha=1.0, gamma=2.0, reduction='mean')."""
    assert predictions.shape == targets.shape
    n = predictions.size

    # Keep native dtype (e.g. bf16) to minimize HBM traffic; cast in-kernel.
    pred_flat = predictions.reshape(-1)
    tgt_flat = targets.reshape(-1)

    # Pad only to a lane multiple (128), and only if needed.  The padded zeros
    # are excluded by the last-tile mask (focal(0, 0) != 0, so they must be).
    n_pad = pl.cdiv(n, LANES) * LANES
    if n_pad != n:
        pred_flat = jnp.pad(pred_flat, (0, n_pad - n))
        tgt_flat = jnp.pad(tgt_flat, (0, n_pad - n))

    rows = n_pad // LANES

    # Sublane granule for the native dtype (f32 -> 8, bf16 -> 16, int8 -> 32).
    itemsize = jnp.dtype(predictions.dtype).itemsize
    sub = max(8, 32 // max(itemsize, 1))

    # Big tiles, but guarantee >= 2 grid tiles for small inputs so both v7x
    # TensorCores get work under dimension_semantics=("parallel",).
    if rows >= 2 * BLOCK_ROWS:
        block_rows = BLOCK_ROWS
    else:
        block_rows = max(sub, pl.cdiv(pl.cdiv(rows, 2), sub) * sub)
    num_tiles = pl.cdiv(rows, block_rows)

    # Valid elements in the last tile (host Python int, baked into the kernel;
    # covers both the <128-element pad and a partial last row-block).
    rem_last = n - (num_tiles - 1) * block_rows * LANES

    pred2d = pred_flat.reshape(rows, LANES)
    tgt2d = tgt_flat.reshape(rows, LANES)

    kernel = _make_focal_kernel(num_tiles, block_rows, rem_last, hard_targets)

    partials = pl.pallas_call(
        kernel,
        out_shape=jax.ShapeDtypeStruct((num_tiles * 8, LANES), jnp.float32),
        grid_spec=pl.GridSpec(
            grid=(num_tiles,),
            in_specs=[
                pl.BlockSpec((block_rows, LANES), lambda i: (i, 0)),
                pl.BlockSpec((block_rows, LANES), lambda i: (i, 0)),
            ],
            out_specs=pl.BlockSpec((8, LANES), lambda i: (i, 0)),
        ),
        compiler_params=pltpu.CompilerParams(
            dimension_semantics=("parallel",),   # no serial accumulation axis
            vmem_limit_bytes=32 * 1024 * 1024,   # headroom; safe on v5e/v6e/v7x
        ),
    )(pred2d, tgt2d)

    # Tiny final cross-lane reduction + mean; fuses under jit.
    return jnp.sum(partials) / jnp.float32(n)


focal_loss_jit = jax.jit(focal_loss, static_argnames=("hard_targets",))


def _focal_loss_ref(predictions, targets):
    # Pure-JAX reference mirroring the PyTorch module (reduction='mean').
    x = predictions.astype(jnp.float32)
    t = targets.astype(jnp.float32)
    bce = jnp.maximum(x, 0.0) - x * t + jnp.log1p(jnp.exp(-jnp.abs(x)))
    p_t = jnp.exp(-bce)
    focal = ALPHA * (1.0 - p_t) ** GAMMA * bce
    return jnp.mean(focal)


if __name__ == "__main__":
    key = jax.random.PRNGKey(0)
    k1, k2 = jax.random.split(key)

    # Small segmentation-style inputs: NCHW logits and binary targets.
    shape = (2, 4, 16, 16)
    predictions = jax.random.normal(k1, shape, dtype=jnp.float32)
    targets = jax.random.bernoulli(k2, p=0.3, shape=shape).astype(jnp.float32)

    loss = focal_loss_jit(predictions, targets)
    loss = jax.block_until_ready(loss)

    ref = _focal_loss_ref(predictions, targets)
    # approx reciprocal (EUP vrcp) is used in-kernel -> allow a small tolerance.
    assert jnp.allclose(loss, ref, rtol=1e-3, atol=1e-6), (loss, ref)

    print("KERNEL_OK")
</pallas_src>

<mosaic_0001>
module attributes {stable_mosaic.version = 11 : i64} {
  func.func @kernel(%arg0: i32, %arg1: memref<8x128xf32, #tpu.memory_space<vmem>>, %arg2: memref<8x128xf32, #tpu.memory_space<vmem>>, %arg3: memref<8x128xf32, #tpu.memory_space<vmem>>) attributes {dimension_semantics = [#tpu.dimension_semantics<parallel>], iteration_bounds = array<i64: 2>, scalar_prefetch = 0 : i64, scratch_operands = 0 : i64, tpu.core_type = #tpu.core_type<tc>, window_params = [{transform_indices = @transform_0, window_bounds = array<i64: 8, 128>}, {transform_indices = @transform_1, window_bounds = array<i64: 8, 128>}, {transform_indices = @transform_2, window_bounds = array<i64: 8, 128>}]} {
    %c0 = arith.constant 0 : index
    %c0_0 = arith.constant 0 : index
    %0 = vector.load %arg1[%c0, %c0_0] : memref<8x128xf32, #tpu.memory_space<vmem>>, vector<8x128xf32>
    %c0_1 = arith.constant 0 : index
    %c0_2 = arith.constant 0 : index
    %1 = vector.load %arg2[%c0_1, %c0_2] : memref<8x128xf32, #tpu.memory_space<vmem>>, vector<8x128xf32>
    %2 = math.absf %0 : vector<8x128xf32>
    %cst = arith.constant 0.000000e+00 : f32
    %3 = vector.broadcast %cst : f32 to vector<8x128xf32>
    %4 = arith.subf %3, %2 : vector<8x128xf32>
    %5 = math.exp %4 : vector<8x128xf32>
    %cst_3 = arith.constant 0.000000e+00 : f32
    %6 = vector.broadcast %cst_3 : f32 to vector<8x128xf32>
    %7 = arith.maximumf %0, %6 : vector<8x128xf32>
    %8 = arith.mulf %0, %1 : vector<8x128xf32>
    %9 = arith.subf %7, %8 : vector<8x128xf32>
    %10 = math.log1p %5 : vector<8x128xf32>
    %11 = arith.addf %9, %10 : vector<8x128xf32>
    %cst_4 = arith.constant 1.000000e+00 : f32
    %12 = vector.broadcast %cst_4 : f32 to vector<8x128xf32>
    %13 = arith.addf %12, %5 : vector<8x128xf32>
    %14 = tpu.reciprocal %13 {approx = true} : vector<8x128xf32> -> vector<8x128xf32>
    %cst_5 = arith.constant 0.000000e+00 : f32
    %15 = vector.broadcast %cst_5 : f32 to vector<8x128xf32>
    %16 = arith.cmpf oge, %0, %15 : vector<8x128xf32>
    %cst_6 = arith.constant 1.000000e+00 : f32
    %17 = vector.broadcast %cst_6 : f32 to vector<8x128xf32>
    %18 = arith.subf %17, %14 : vector<8x128xf32>
    %19 = arith.select %16, %14, %18 : vector<8x128xi1>, vector<8x128xf32>
    %20 = arith.addf %1, %19 : vector<8x128xf32>
    %cst_7 = arith.constant 2.000000e+00 : f32
    %21 = vector.broadcast %cst_7 : f32 to vector<8x128xf32>
    %22 = arith.mulf %21, %1 : vector<8x128xf32>
    %23 = arith.mulf %22, %19 : vector<8x128xf32>
    %24 = arith.subf %20, %23 : vector<8x128xf32>
    %25 = arith.mulf %24, %24 : vector<8x128xf32>
    %26 = arith.mulf %25, %11 : vector<8x128xf32>
    %27 = vector.shape_cast %26 : vector<8x128xf32> to vector<1x8x128xf32>
    %cst_8 = arith.constant dense<0.000000e+00> : vector<8x128xf32>
    %28 = vector.multi_reduction <add>, %27, %cst_8 [0] : vector<1x8x128xf32> to vector<8x128xf32>
    %c0_9 = arith.constant 0 : index
    %c0_10 = arith.constant 0 : index
    %29 = vector.load %arg3[%c0_9, %c0_10] : memref<8x128xf32, #tpu.memory_space<vmem>>, vector<8x128xf32>
    tpu.vector_store %arg3[%c0_9, %c0_10], %28 {strides = array<i32>} : memref<8x128xf32, #tpu.memory_space<vmem>>, vector<8x128xf32>,
    return
  }
  func.func @transform_0(%arg0: i32) -> (i32, i32) {
    %c0_i32 = arith.constant 0 : i32
    %c0_i32_0 = arith.constant 0 : i32
    return %arg0, %c0_i32 : i32, i32
  }
  func.func @transform_1(%arg0: i32) -> (i32, i32) {
    %c0_i32 = arith.constant 0 : i32
    %c0_i32_0 = arith.constant 0 : i32
    return %arg0, %c0_i32 : i32, i32
  }
  func.func @transform_2(%arg0: i32) -> (i32, i32) {
    %c0_i32 = arith.constant 0 : i32
    %c0_i32_0 = arith.constant 0 : i32
    return %arg0, %c0_i32 : i32, i32
  }
}

</mosaic_0001>

<bundles_post_ra>
// kernel: focal_loss.1
= control target key start
LH: loop header
LB: loop body
LE: loop exit
PB: predicated region body
PF: predicated region fallthrough
CT: control target
= control target key end

     0   :  { %s300_s9 = smov 0   ;;  %s325_s0 = inlined_call_operand.vmem [shape: f32[16,128], index: 0, kind: input, shape index: {}]   ;;  %s326_s1 = inlined_call_operand.vmem [shape: f32[16,128], index: 1, kind: input, shape index: {}]   ;;  %s327_s2 = inlined_call_operand.vmem [shape: f32[16,128], index: 2, kind: output, shape index: {}]  }
   0x1 LB: > { %s253_s10 = sadd.s32 4294967295, %s283_s9   ;;  %p257_p0 = scmp.ge.s32.totalorder %s283_s9, 1  ;;  %s283_s9 = sphi %s300_s9, %s12_s9  }
   0x2   : > { %p120_p1 = scmp.lt.s32.totalorder %s283_s9, 3 }
   0x4   : > { %p121_p2 = pnand %p257_p0, %p120_p1 }
   0x5   : > { %p144_p3 = scmp.lt.s32.totalorder (!%p121_p2), %s253_s10, 1 }
   0x6   : > { %124 = sbr.rel (%p121_p2) target bundleno = 64 (0x40), region = 28 }
   0xb   : > { %s329_s10 = smov (!%p144_p3, %s253_s10), 1 }
   0xc   : > { %s308_s11 = sshll.u32 %s329_s10, 3 }
   0xd   : > { %s147_s14 = scalar_lea.vmem %s325_s0, %s308_s11  ;;  %s151_s17 = scalar_lea.vmem %s326_s1, %s308_s11 }
   0xe   : > { %v156_v0 = vld [vmem:[%s147_s14] sm:$0xff]  ;;  %s155_s20 = scalar_lea.vmem %s327_s2, %s308_s11 }
   0xf   : > { %v158_v1 = vand.u32 2147483647, %v156_v0  ;;  %v157_v9 = vld [vmem:[%s151_s17] sm:$0xff]  ;;  %v162_v10 = vmax.f32 %v156_v0, 0.0  ;;  %vm177_vm1 = vcmp.ge.f32.partialorder %v156_v0, 0.0 }
  0x10   : > { %v163_v11 = vmul.f32 %v157_v9, %v156_v0  ;;  %v181_v16 = vmul.f32 2.0, %v157_v9 }
  0x11   : > { %v159_v2 = vsub.f32 0.0, %v158_v1 }
  0x12   : > { %v164_v18 = vsub.f32 %v162_v10, %v163_v11 }
  0x13   : > { %v160_v3 = vmul.f32 1.442695, %v159_v2 }
  0x15   : > { %271 = vpow2.f32 %v160_v3 }
  0x22   : > { %v272_v4 = vpop.eup %271 }
  0x23   : > { %v165_v5 = vadd.f32 1.0, %v272_v4  ;;  %v168_v6 = vmul.f32 -0.5, %v272_v4  ;;  %v171_v8 = vand.u32 2147483647, %v272_v4 }
  0x25   : > { %273 = vlog2.f32 %v165_v5  ;;  %v169_v7 = vadd.f32 1.0, %v168_v6  ;;  %vm172_vm0 = vcmp.lt.f32.partialorder %v171_v8, 0.0004427343 }
  0x26   : > { %275 = vrcp.f32 %v165_v5 }
  0x27   : > { %v170_v13 = vmul.f32 %v272_v4, %v169_v7 }
  0x32   : > { %v274_v12 = vpop.eup %273 }
  0x33   : > { %v276_v14 = vpop.eup %275  ;;  %v167_v15 = vmul.f32 0.6931472, %v274_v12 }
  0x34   : > { %v178_v17 = vsub.f32 1.0, %v276_v14 }
  0x35   : > { %v173_v19 = vsel %vm172_vm0, %v170_v13, %v167_v15 }
  0x36   : > { %v179_v20 = vsel %vm177_vm1, %v276_v14, %v178_v17  ;;  %v174_v23 = vadd.f32 %v173_v19, %v164_v18 }
  0x37   : > { %v180_v21 = vadd.f32 %v179_v20, %v157_v9  ;;  %v182_v22 = vmul.f32 %v181_v16, %v179_v20 }
  0x39   : > { %v183_v24 = vsub.f32 %v180_v21, %v182_v22 }
  0x3b   : > { %v184_v25 = vmul.f32 %v183_v24, %v183_v24 }
  0x3d   : > { %v185_v26 = vmul.f32 %v184_v25, %v174_v23 }
  0x3f   : > { %187 = vst [vmem:[%s155_s20] sm:$0xff] %v185_v26 }
  0x40 PF: > { %s12_s9 = sadd.s32 1, %s283_s9  }
  0x41   : > { %p9_p4 = scmp.ge.s32.totalorder %s12_s9, 4  }
  0x43   :  { %11 = sbr.rel (!%p9_p4) target bundleno = 1 (0x1), region = 61 }

</bundles_post_ra>
